<compile_context>
chip_gen: v5e
topology: v5e:2x2
jax: 0.10.0
libtpu: 0.0.40
codegen_flags: <defaults>
</compile_context>

<pallas_src>
import jax
import jax.numpy as jnp
from jax import lax
from jax.experimental import pallas as pl
from jax.experimental.pallas import tpu as pltpu


def build_alpha(num_class, alpha=None, balance_index=-1):
    """Mirror of the PyTorch __init__ alpha handling. Returns (C, 1) float32."""
    if alpha is None:
        return jnp.ones((num_class, 1), jnp.float32)
    if isinstance(alpha, (list, tuple)):
        a = jnp.asarray(alpha, jnp.float32).reshape(num_class, 1)
        return a / jnp.sum(a)
    if isinstance(alpha, float):
        a = jnp.full((num_class, 1), 1.0 - alpha, jnp.float32)
        return a.at[balance_index, 0].set(alpha)
    raise TypeError("Not support alpha type")


def focal_loss(inp, target, *, num_class, alpha_vec, gamma=2.0, smooth=None,
               size_average=True, tile_s=32768):
    """inp: (N, C) or (N, C, spatial...) float; target: int class indices with
    N*prod(spatial) total elements; alpha_vec: (C, 1) float32. Returns scalar f32."""
    C = int(num_class)
    x = inp.astype(jnp.float32)

    if x.ndim > 2:
        # Native layout already has C second-to-last and spatial last: pure view,
        # no HBM transpose pass.
        N = x.shape[0]
        x = x.reshape(N, C, -1)                          # (N, C, S) view
        t = target.reshape(N, 1, -1).astype(jnp.int32)   # (N, 1, S)
    else:
        # 2-D (M, C) path: one small transpose so samples land on lanes.
        # TODO(synk): could avoid this transpose with a classes-on-lanes variant.
        x = jnp.transpose(x).reshape(1, C, -1)           # (1, C, M)
        t = target.reshape(1, 1, -1).astype(jnp.int32)
        N = 1
    S = x.shape[2]
    M = N * S

    # ---- tile-size selection (VMEM-budgeted, lane-dense) -------------------
    # per-lane VMEM estimate: double-buffered logits+target input blocks plus
    # ~8 (C, TILE) f32 temporaries (exp, one-hot, key, masks, ...).
    per_lane_bytes = 4 * (2 * 2 * (C + 1) + 8 * C)
    budget = 40 << 20                     # leaves headroom on v7x's 64 MiB VMEM
    cap = max(128, (budget // per_lane_bytes) // 128 * 128)
    desired = max(128, (int(tile_s) // 128) * 128)
    desired = min(desired, cap)
    TILE_S = S if S <= desired else desired       # full dim or a 128-multiple
    grid = (N, pl.cdiv(S, TILE_S))

    # Explicit scoped-VMEM limit (v5e default is 16 MiB; cap well below v7x's 64 MiB).
    vmem_limit = int(min(max(per_lane_bytes * TILE_S + (2 << 20), 16 << 20), 48 << 20))

    g = float(gamma)
    int_gamma = int(g) if (g >= 0.0 and g.is_integer()) else None

    def kernel(x_ref, t_ref, a_ref, part_ref, acc_ref):
        s = pl.program_id(1)

        @pl.when(s == 0)
        def _init():
            acc_ref[0] = jnp.float32(0.0)     # sum of focal terms (this batch row)
            acc_ref[1] = jnp.float32(0.0)     # sum of alpha[target] (this batch row)

        xt = x_ref[...]                                   # (C, TILE_S) f32
        # TODO(synk): with C < 8 only half the sublanes are used; folding two
        # sample groups into the sublane axis could help on v7x once EUP-bound.
        mx = jnp.max(xt, axis=0, keepdims=True)           # (1, TILE_S)
        ex = jnp.exp(xt - mx)                             # (C, TILE_S)
        denom = jnp.sum(ex, axis=0, keepdims=True)        # (1, TILE_S)

        tgt = t_ref[...]                                  # (1, TILE_S) int32
        cls_ids = lax.broadcasted_iota(jnp.int32, (C, TILE_S), 0)
        one_hot = (cls_ids == tgt).astype(jnp.float32)    # (C, TILE_S)

        key = one_hot
        if smooth:                                        # mirrors `if self.smooth:`
            key = jnp.clip(key, smooth, 1.0 - smooth)

        # pt = sum_c key*softmax = sum_c(key*ex) / sum_c(ex): divide only the
        # (1, TILE_S) vectors, never normalize the full (C, TILE_S) tensor.
        num = jnp.sum(key * ex, axis=0, keepdims=True)
        pt = num / denom + 1e-10                          # (1, TILE_S)
        logpt = jnp.log(pt)
        one_minus = 1.0 - pt
        if int_gamma is not None:                         # integer gamma: VPU multiplies
            w = jnp.ones_like(one_minus)
            for _ in range(int_gamma):
                w = w * one_minus
        else:                                             # fractional gamma only
            w = jnp.power(one_minus, jnp.float32(g))
        focal = -w * logpt                                # (1, TILE_S)

        # Mask lanes past the true spatial extent (no wrapper-side padding).
        col = s * TILE_S + lax.broadcasted_iota(jnp.int32, (1, TILE_S), 1)
        valid = col < S
        acc_ref[0] = acc_ref[0] + jnp.sum(jnp.where(valid, focal, 0.0))

        # alpha[target] via per-class counts dotted with alpha (uses the
        # un-clamped one-hot, matching torch's alpha[idx]).
        counts = jnp.sum(jnp.where(valid, one_hot, 0.0), axis=1, keepdims=True)  # (C,1)
        acc_ref[1] = acc_ref[1] + jnp.sum(counts * a_ref[...])

        @pl.when(s == pl.num_programs(1) - 1)
        def _finalize():
            # Per-batch-row partials: sublane 0 = sum_focal, sublane 1 = sum_alpha.
            sub = lax.broadcasted_iota(jnp.int32, (1, 8, 128), 1)
            part_ref[...] = jnp.where(
                sub == 0, acc_ref[0], jnp.where(sub == 1, acc_ref[1], 0.0))

    part = pl.pallas_call(
        kernel,
        out_shape=jax.ShapeDtypeStruct((N, 8, 128), jnp.float32),
        grid=grid,
        in_specs=[
            pl.BlockSpec((pl.Squeezed(), C, TILE_S), lambda n, s: (n, 0, s)),  # logits
            pl.BlockSpec((pl.Squeezed(), 1, TILE_S), lambda n, s: (n, 0, s)),  # targets
            pl.BlockSpec((C, 1), lambda n, s: (0, 0)),                         # alpha
        ],
        out_specs=pl.BlockSpec((1, 8, 128), lambda n, s: (n, 0, 0)),
        scratch_shapes=[pltpu.SMEM((2,), jnp.float32)],   # [sum_focal, sum_alpha]
        compiler_params=pltpu.CompilerParams(
            dimension_semantics=("parallel", "arbitrary"),  # batch axis megacore-shardable
            vmem_limit_bytes=vmem_limit),
    )(x, t, alpha_vec)

    sum_focal = jnp.sum(part[:, 0, 0])
    sum_alpha = jnp.sum(part[:, 1, 0])
    total = sum_alpha * sum_focal            # reproduces the (M,1,M) broadcast quirk
    if size_average:
        total = total / jnp.float32(M) / jnp.float32(M)
    return total


def _focal_loss_ref(inp, target, alpha_vec, gamma=2.0, smooth=None, size_average=True):
    """Pure-JAX reference mirroring the PyTorch forward (incl. the (M,1,M) broadcast)."""
    C = alpha_vec.shape[0]
    logit = jax.nn.softmax(inp.astype(jnp.float32), axis=1)
    if logit.ndim > 2:
        n = logit.shape[0]
        logit = logit.reshape(n, C, -1)
        logit = jnp.transpose(logit, (0, 2, 1)).reshape(-1, C)
    t = target.reshape(-1).astype(jnp.int32)
    one_hot = jax.nn.one_hot(t, C, dtype=jnp.float32)
    key = one_hot
    if smooth:
        key = jnp.clip(key, smooth, 1.0 - smooth)
    pt = jnp.sum(key * logit, axis=1) + 1e-10
    logpt = jnp.log(pt)
    focal = -jnp.power(1.0 - pt, gamma) * logpt
    alpha_sel = alpha_vec.reshape(-1)[t]
    loss = alpha_sel[:, None, None] * focal[None, None, :]    # torch shape (M,1,M)
    return jnp.mean(loss) if size_average else jnp.sum(loss)


if __name__ == "__main__":
    key = jax.random.PRNGKey(0)
    k_x, k_t = jax.random.split(key)

    num_class, n, h, w = 4, 2, 16, 16
    x = jax.random.normal(k_x, (n, num_class, h, w), dtype=jnp.float32)
    target = jax.random.randint(k_t, (n, h, w), 0, num_class, dtype=jnp.int32)

    # Case 1: default alpha, gamma=2, mean reduction.
    alpha_vec = build_alpha(num_class, alpha=None)
    out = focal_loss(x, target, num_class=num_class, alpha_vec=alpha_vec,
                     gamma=2.0, smooth=None, size_average=True)
    out = jax.block_until_ready(out)
    ref = _focal_loss_ref(x, target, alpha_vec, gamma=2.0, smooth=None, size_average=True)
    assert jnp.allclose(out, ref, rtol=1e-4, atol=1e-5), (out, ref)

    # Case 2: list alpha, label smoothing, sum reduction.
    alpha_vec2 = build_alpha(num_class, alpha=[1.0, 2.0, 3.0, 4.0])
    out2 = focal_loss(x, target, num_class=num_class, alpha_vec=alpha_vec2,
                      gamma=2.0, smooth=0.1, size_average=False)
    out2 = jax.block_until_ready(out2)
    ref2 = _focal_loss_ref(x, target, alpha_vec2, gamma=2.0, smooth=0.1,
                           size_average=False)
    assert jnp.allclose(out2, ref2, rtol=1e-4, atol=1e-4), (out2, ref2)

    print("KERNEL_OK")
</pallas_src>

<mosaic_0001>
module attributes {stable_mosaic.version = 11 : i64} {
  func.func @kernel(%arg0: i32, %arg1: i32, %arg2: memref<1x4x256xf32, #tpu.memory_space<vmem>>, %arg3: memref<1x1x256xi32, #tpu.memory_space<vmem>>, %arg4: memref<4x1xf32, #tpu.memory_space<vmem>>, %arg5: memref<1x8x128xf32, #tpu.memory_space<vmem>>, %arg6: memref<2xf32, #tpu.memory_space<smem>>) attributes {dimension_semantics = [#tpu.dimension_semantics<parallel>, #tpu.dimension_semantics<arbitrary>], iteration_bounds = array<i64: 2, 1>, scalar_prefetch = 0 : i64, scratch_operands = 1 : i64, tpu.core_type = #tpu.core_type<tc>, window_params = [{transform_indices = @transform_0, window_bounds = array<i64: 1, 4, 256>}, {transform_indices = @transform_1, window_bounds = array<i64: 1, 1, 256>}, {pipeline_mode = #tpu.pipeline_mode<synchronous>, transform_indices = @transform_2, window_bounds = array<i64: 4, 1>}, {transform_indices = @transform_3, window_bounds = array<i64: 1, 8, 128>}]} {
    %c0_i32 = arith.constant 0 : i32
    %0 = arith.cmpi eq, %arg1, %c0_i32 : i32
    %1 = arith.extui %0 : i1 to i32
    %c0_i32_0 = arith.constant 0 : i32
    %2 = arith.cmpi ne, %1, %c0_i32_0 : i32
    scf.if %2 {
      %cst_25 = arith.constant 0.000000e+00 : f32
      %c0_26 = arith.constant 0 : index
      %67 = memref.load %arg6[%c0_26] : memref<2xf32, #tpu.memory_space<smem>>
      memref.store %cst_25, %arg6[%c0_26] : memref<2xf32, #tpu.memory_space<smem>>
      %cst_27 = arith.constant 0.000000e+00 : f32
      %c1_28 = arith.constant 1 : index
      %68 = memref.load %arg6[%c1_28] : memref<2xf32, #tpu.memory_space<smem>>
      memref.store %cst_27, %arg6[%c1_28] : memref<2xf32, #tpu.memory_space<smem>>
    } else {
    }
    %c0 = arith.constant 0 : index
    %c0_1 = arith.constant 0 : index
    %c0_2 = arith.constant 0 : index
    %3 = vector.load %arg2[%c0, %c0_1, %c0_2] : memref<1x4x256xf32, #tpu.memory_space<vmem>>, vector<1x4x256xf32>
    %4 = vector.shape_cast %3 : vector<1x4x256xf32> to vector<4x256xf32>
    %cst = arith.constant dense<0xFF800000> : vector<256xf32>
    %5 = vector.multi_reduction <maximumf>, %4, %cst [0] : vector<4x256xf32> to vector<256xf32>
    %6 = vector.shape_cast %5 : vector<256xf32> to vector<1x256xf32>
    %7 = vector.broadcast %6 : vector<1x256xf32> to vector<4x256xf32>
    %8 = arith.subf %4, %7 : vector<4x256xf32>
    %9 = math.exp %8 : vector<4x256xf32>
    %cst_3 = arith.constant dense<0.000000e+00> : vector<256xf32>
    %10 = vector.multi_reduction <add>, %9, %cst_3 [0] : vector<4x256xf32> to vector<256xf32>
    %11 = vector.shape_cast %10 : vector<256xf32> to vector<1x256xf32>
    %c0_4 = arith.constant 0 : index
    %c0_5 = arith.constant 0 : index
    %c0_6 = arith.constant 0 : index
    %12 = vector.load %arg3[%c0_4, %c0_5, %c0_6] : memref<1x1x256xi32, #tpu.memory_space<vmem>>, vector<1x1x256xi32>
    %13 = vector.shape_cast %12 : vector<1x1x256xi32> to vector<1x256xi32>
    %14 = tpu.iota {dimensions = array<i32: 0>} : vector<4x256xi32>
    %15 = vector.broadcast %13 : vector<1x256xi32> to vector<4x256xi32>
    %16 = arith.cmpi eq, %14, %15 : vector<4x256xi32>
    %17 = arith.extui %16 : vector<4x256xi1> to vector<4x256xi32>
    %18 = arith.sitofp %17 : vector<4x256xi32> to vector<4x256xf32>
    %19 = arith.mulf %18, %9 : vector<4x256xf32>
    %cst_7 = arith.constant dense<0.000000e+00> : vector<256xf32>
    %20 = vector.multi_reduction <add>, %19, %cst_7 [0] : vector<4x256xf32> to vector<256xf32>
    %21 = vector.shape_cast %20 : vector<256xf32> to vector<1x256xf32>
    %22 = arith.divf %21, %11 : vector<1x256xf32>
    %cst_8 = arith.constant 1.000000e-10 : f32
    %23 = vector.broadcast %cst_8 : f32 to vector<1x256xf32>
    %24 = arith.addf %22, %23 : vector<1x256xf32>
    %25 = math.log %24 : vector<1x256xf32>
    %cst_9 = arith.constant 1.000000e+00 : f32
    %26 = vector.broadcast %cst_9 : f32 to vector<1x256xf32>
    %27 = arith.subf %26, %24 : vector<1x256xf32>
    %cst_10 = arith.constant 1.000000e+00 : f32
    %28 = vector.broadcast %cst_10 : f32 to vector<1x256xf32>
    %29 = arith.mulf %28, %27 : vector<1x256xf32>
    %30 = arith.mulf %29, %27 : vector<1x256xf32>
    %cst_11 = arith.constant 0.000000e+00 : f32
    %31 = vector.broadcast %cst_11 : f32 to vector<1x256xf32>
    %32 = arith.subf %31, %30 : vector<1x256xf32>
    %33 = arith.mulf %32, %25 : vector<1x256xf32>
    %c256_i32 = arith.constant 256 : i32
    %34 = arith.muli %arg1, %c256_i32 : i32
    %35 = tpu.iota {dimensions = array<i32: 1>} : vector<1x256xi32>
    %36 = vector.broadcast %34 : i32 to vector<1x256xi32>
    %37 = arith.addi %36, %35 : vector<1x256xi32>
    %c256_i32_12 = arith.constant 256 : i32
    %38 = vector.broadcast %c256_i32_12 : i32 to vector<1x256xi32>
    %39 = arith.cmpi slt, %37, %38 : vector<1x256xi32>
    %c0_13 = arith.constant 0 : index
    %40 = memref.load %arg6[%c0_13] : memref<2xf32, #tpu.memory_space<smem>>
    %cst_14 = arith.constant 0.000000e+00 : f32
    %41 = vector.broadcast %cst_14 : f32 to vector<1x256xf32>
    %42 = arith.select %39, %33, %41 : vector<1x256xi1>, vector<1x256xf32>
    %43 = vector.shape_cast %42 : vector<1x256xf32> to vector<1x1x256xf32>
    %cst_15 = arith.constant dense<0.000000e+00> : vector<1xf32>
    %44 = vector.multi_reduction <add>, %43, %cst_15 [1, 2] : vector<1x1x256xf32> to vector<1xf32>
    %45 = vector.shape_cast %44 : vector<1xf32> to vector<1x1x1xf32>
    %46 = vector.extract %45[0, 0, 0] : f32 from vector<1x1x1xf32>
    %47 = arith.addf %40, %46 : f32
    %c0_16 = arith.constant 0 : index
    %48 = memref.load %arg6[%c0_16] : memref<2xf32, #tpu.memory_space<smem>>
    memref.store %47, %arg6[%c0_16] : memref<2xf32, #tpu.memory_space<smem>>
    %cst_17 = arith.constant 0.000000e+00 : f32
    %49 = vector.shape_cast %39 : vector<1x256xi1> to vector<1x256xi1>
    %50 = vector.broadcast %49 : vector<1x256xi1> to vector<4x256xi1>
    %51 = vector.broadcast %cst_17 : f32 to vector<4x256xf32>
    %52 = arith.select %50, %18, %51 : vector<4x256xi1>, vector<4x256xf32>
    %cst_18 = arith.constant dense<0.000000e+00> : vector<4xf32>
    %53 = vector.multi_reduction <add>, %52, %cst_18 [1] : vector<4x256xf32> to vector<4xf32>
    %54 = vector.shape_cast %53 : vector<4xf32> to vector<4x1xf32>
    %c1 = arith.constant 1 : index
    %55 = memref.load %arg6[%c1] : memref<2xf32, #tpu.memory_space<smem>>
    %c0_19 = arith.constant 0 : index
    %c0_20 = arith.constant 0 : index
    %56 = vector.load %arg4[%c0_19, %c0_20] : memref<4x1xf32, #tpu.memory_space<vmem>>, vector<4x1xf32>
    %57 = arith.mulf %54, %56 : vector<4x1xf32>
    %58 = vector.shape_cast %57 : vector<4x1xf32> to vector<1x4x1xf32>
    %cst_21 = arith.constant dense<0.000000e+00> : vector<1xf32>
    %59 = vector.multi_reduction <add>, %58, %cst_21 [1, 2] : vector<1x4x1xf32> to vector<1xf32>
    %60 = vector.shape_cast %59 : vector<1xf32> to vector<1x1x1xf32>
    %61 = vector.extract %60[0, 0, 0] : f32 from vector<1x1x1xf32>
    %62 = arith.addf %55, %61 : f32
    %c1_22 = arith.constant 1 : index
    %63 = memref.load %arg6[%c1_22] : memref<2xf32, #tpu.memory_space<smem>>
    memref.store %62, %arg6[%c1_22] : memref<2xf32, #tpu.memory_space<smem>>
    %c0_i32_23 = arith.constant 0 : i32
    %64 = arith.cmpi eq, %arg1, %c0_i32_23 : i32
    %65 = arith.extui %64 : i1 to i32
    %c0_i32_24 = arith.constant 0 : i32
    %66 = arith.cmpi ne, %65, %c0_i32_24 : i32
    scf.if %66 {
      %67 = tpu.iota {dimensions = array<i32: 1>} : vector<1x8x128xi32>
      %c0_i32_25 = arith.constant 0 : i32
      %68 = vector.broadcast %c0_i32_25 : i32 to vector<1x8x128xi32>
      %69 = arith.cmpi eq, %67, %68 : vector<1x8x128xi32>
      %c0_26 = arith.constant 0 : index
      %70 = memref.load %arg6[%c0_26] : memref<2xf32, #tpu.memory_space<smem>>
      %c1_i32 = arith.constant 1 : i32
      %71 = vector.broadcast %c1_i32 : i32 to vector<1x8x128xi32>
      %72 = arith.cmpi eq, %67, %71 : vector<1x8x128xi32>
      %c1_27 = arith.constant 1 : index
      %73 = memref.load %arg6[%c1_27] : memref<2xf32, #tpu.memory_space<smem>>
      %cst_28 = arith.constant 0.000000e+00 : f32
      %74 = vector.broadcast %73 : f32 to vector<1x8x128xf32>
      %75 = vector.broadcast %cst_28 : f32 to vector<1x8x128xf32>
      %76 = arith.select %72, %74, %75 : vector<1x8x128xi1>, vector<1x8x128xf32>
      %77 = vector.broadcast %70 : f32 to vector<1x8x128xf32>
      %78 = arith.select %69, %77, %76 : vector<1x8x128xi1>, vector<1x8x128xf32>
      %c0_29 = arith.constant 0 : index
      %c0_30 = arith.constant 0 : index
      %c0_31 = arith.constant 0 : index
      %79 = vector.load %arg5[%c0_29, %c0_30, %c0_31] : memref<1x8x128xf32, #tpu.memory_space<vmem>>, vector<1x8x128xf32>
      tpu.vector_store %arg5[%c0_29, %c0_30, %c0_31], %78 {strides = array<i32>} : memref<1x8x128xf32, #tpu.memory_space<vmem>>, vector<1x8x128xf32>,
    } else {
    }
    return
  }
  func.func @transform_0(%arg0: i32, %arg1: i32) -> (i32, i32, i32) {
    %c0_i32 = arith.constant 0 : i32
    %c0_i32_0 = arith.constant 0 : i32
    return %arg0, %c0_i32, %arg1 : i32, i32, i32
  }
  func.func @transform_1(%arg0: i32, %arg1: i32) -> (i32, i32, i32) {
    %c0_i32 = arith.constant 0 : i32
    %c0_i32_0 = arith.constant 0 : i32
    return %arg0, %c0_i32, %arg1 : i32, i32, i32
  }
  func.func @transform_2(%arg0: i32, %arg1: i32) -> (i32, i32) {
    %c0_i32 = arith.constant 0 : i32
    %c0_i32_0 = arith.constant 0 : i32
    %c0_i32_1 = arith.constant 0 : i32
    return %c0_i32, %c0_i32_0 : i32, i32
  }
  func.func @transform_3(%arg0: i32, %arg1: i32) -> (i32, i32, i32) {
    %c0_i32 = arith.constant 0 : i32
    %c0_i32_0 = arith.constant 0 : i32
    %c0_i32_1 = arith.constant 0 : i32
    return %arg0, %c0_i32, %c0_i32_0 : i32, i32, i32
  }
}

</mosaic_0001>

<bundles_post_ra>
// kernel: tpu_custom_call.1
= control target key start
LH: loop header
LB: loop body
LE: loop exit
PB: predicated region body
PF: predicated region fallthrough
CT: control target
= control target key end

     0   :  { %8 = vsyncpa [#allocation4], 0  ;;  %s933_s0 = inlined_call_operand.hbm [shape: f32[2,4,256], index: 0, kind: input, shape index: {}]   ;;  %s934_s1 = inlined_call_operand.vmem [shape: s32[2,1,256], index: 1, kind: input, shape index: {}]   ;;  %s935_s2 = inlined_call_operand.vmem [shape: f32[4,1], index: 2, kind: input, shape index: {}]   ;;  %s936_s3 = inlined_call_operand.hbm [shape: f32[2,8,128], index: 3, kind: output, shape index: {}]  }
   0x1   :  { %10 = vsyncpa [#allocation4 + $0x1], 0 }
   0x2   :  { %11 = vsyncpa [#allocation5], 0 }
   0x3   :  { %13 = vsyncpa [#allocation5 + $0x1], 0  ;;  %s785_s12 = smov 0   ;;  %s787_s13 = smov 0  }
   0x4   :  { %s789_s14 = smov 0   ;;  %s791_s15 = smov 0  }
   0x5   :  { %s793_s16 = smov 0   ;;  %s795_s17 = smov 0  }
   0x6 LB: > { %s553_s18 = sadd.s32 4294967295, %s762_s17   ;;  %s554_s19 = sadd.s32 4294967294, %s762_s17   ;;  %s762_s17 = sphi %s795_s17, %s19_s17   ;;  %s758_s16 = sphi %s793_s16, %s945_s16   ;;  %s754_s15 = sphi %s791_s15, %s944_s15   ;;  %s750_s14 = sphi %s789_s14, %s943_s14   ;;  %s746_s13 = sphi %s787_s13, %s942_s13   ;;  %s742_s12 = sphi %s785_s12, %s941_s12  }
   0x7   : > { %s31_s20 = sadd.s32 1, %s758_s16  ;;  %s40_s21 = sadd.s32 1, %s750_s14 }
   0x8   : > { %p33_p0 = scmp.ge.s32.totalorder %s31_s20, 2  ;;  %p47_p1 = scmp.ne.s32.totalorder %s750_s14, %s746_s13 }
   0x9   : > { %p48_p2 = scmp.eq.s32.totalorder %s762_s17, 0  ;;  %p53_p3 = scmp.ne.s32.totalorder %s746_s13, %s742_s12 }
   0xa   : > { %s947_s20 = smov (%p33_p0, %s31_s20), 0  ;;  %p54_p5 = scmp.eq.s32.totalorder %s553_s18, 0 }
   0xb   : > { %p826_p4 = por %p48_p2, %p47_p1  ;;  %s35_s23 = ssub.s32 %s758_s16, %s947_s20 }
   0xc   : > { %p126_p6 = scmp.eq.s32.totalorder %s553_s18, 1  ;;  %p38_p7 = scmp.eq.s32.totalorder %s35_s23, 0 }
   0xd   : > { %p832_p8 = por %p54_p5, %p53_p3  ;;  %p132_p10 = scmp.eq.s32.totalorder %s554_s19, 1 }
   0xe   : > { %p836_p9 = por %p126_p6, %p47_p1  ;;  %p556_p12 = scmp.ge.s32.totalorder %s762_s17, 2 }
   0xf   : > { %s841_s26 = scalar_select %p38_p7, %s750_s14, %s40_s21  }
  0x10   : > { %p843_p11 = por %p132_p10, %p53_p3  ;;  %p589_p13 = scmp.lt.s32.totalorder %s762_s17, 2 }
  0x11   : > { %s155_s28 = sand.u32 1, %s750_s14   ;;  %s572_s30 = sshll.u32 %s758_s16, 3 }
  0x12   : > { %s557_s29 = sshll.u32 %s155_s28, 3  ;;  %s166_s6 = scalar_lea.hbm %s933_s0, %s572_s30 }
  0x13   : > { %s159_s7 = scalar_lea.vmem [#allocation3], %s557_s29  ;;  %s168_s9 = sshll.u32 %s166_s6, 4  ;;  %s169_s9 = int_to_ptr.hbm [resolvable:$true] %s168_s9 }
  0x14   : > { %s170_s8 = sshll.u32 %s159_s7, 4  ;;  %p582_p0 = pnand %p589_p13, %p826_p4  ;;  %s171_s8 = int_to_ptr.vmem [resolvable:$true] %s170_s8 }
  0x15   : > { %p560_p1 = scmp.ge.s32.totalorder %s762_s17, 1  ;;  %p187_p2 = scmp.lt.s32.totalorder %s762_s17, 3 }
  0x16   : > { %s156_s10 = scalar_lea.sflag [#allocation4], %s155_s28 }
  0x17   : > { %584 = dma.hbm_to_vmem [thread:$0]  (!%p582_p0), %s169_s9, 128, %s171_s8, %s156_s10  }
  0x18   : > { %p188_p3 = pnand %p560_p1, %p187_p2 }
  0x19   : > { %s859_s11 = sand.u32 (!%p188_p3), 1, %s746_s13  }
  0x1a   : > { %191 = sbr.rel (%p188_p3) target bundleno = 349 (0x15d), region = 32  ;;  %s561_s18 = sshll.u32 (!%p188_p3), %s859_s11, 3 }
  0x1b   : > { %s194_s19 = scalar_lea.sflag (!%p188_p3), [#allocation4], %s859_s11  ;;  %s197_s21 = scalar_lea.vmem (!%p188_p3), [#allocation3], %s561_s18 }
  0x1f   : > { %733 = dma.done.wait (%p832_p8), %s194_s19, 128  }
  0x20   : > { %735 = vsyncadd (%p832_p8), %s194_s19, 4294967168  ;;  %p231_p4 = scmp.lt.s32.totalorder %s754_s15, 1  ;;  %v298_v0 = vlaneseq  ;;  %v247_v3 = vld [vmem:[%s197_s21] sm:$0xff]  ;;  %vm254_vm0 = vcmask 1043456   ;;  %v764_v6 = vmov 0.0   ;;  %vm385_vm11 = vcmask 1040384  }
  0x21   : > { %249 = vst [vmem:[#allocation1] ss:$2 sm:$0xff] %v247_v3  ;;  %vm415_vm12 = vcmask 3072   ;;  %s569_s5 = sshll.u32 %s754_s15, 3  ;;  %s228_s9 = scalar_lea.vmem [#allocation6], %s561_s18 }
  0x22   : > { %s232_s22 = scalar_select %p231_p4, %s754_s15, 1  ;;  %v874_v1 = vshrl.u32 %v298_v0, 7 }
  0x23   : > { %s452_s8 = scalar_lea.hbm %s936_s3, %s569_s5  ;;  %s454_s10 = sshll.u32 %s228_s9, 4  ;;  %s455_s10 = int_to_ptr.vmem [resolvable:$true] %s454_s10 }
  0x24   : > { %s563_s23 = sshll.u32 %s232_s22, 1  ;;  %vm434_vm13 = vcmp.eq.s32.totalorder %v874_v1, 1  ;;  %s456_s21 = sshll.u32 %s452_s8, 4  ;;  %vm432_vm14 = vcmp.eq.s32.totalorder %v874_v1, 0  ;;  %s457_s21 = int_to_ptr.hbm [resolvable:$true] %s456_s21 }
  0x25   : > { %s237_s30 = scalar_lea.vmem %s934_s1, %s563_s23  ;;  %s442_s15 = scalar_lea.sflag [#allocation5], %s859_s11 }
  0x26   : > { %v297_v2 = vld [vmem:[%s237_s30] sm:$0x3]  ;;  %s694_s23 = sshra.s32 %s457_s21, 4  ;;  %s700_s30 = scalar_lea.hbm %s936_s3, 16  ;;  %s695_s23 = int_to_ptr.hbm [resolvable:$true] %s694_s23 }
  0x27   : > { %v300_v4 = vperm.slane %v297_v2, 0  ;;  %v301_v5 = vperm.slane %v297_v2, 1  ;;  %s696_s18 = scalar_lea.hbm %s695_s23, 8  ;;  %p701_p8 = scmp.lt.s32.totalorder %s695_s23, %s936_s3 }
  0x28   : > { %v250_v12 = vld.sshfl [vmem:[#allocation1] sm:$0xff pattern:$0x75316420]  ;;  %v251_v13 = vld.sshfl [vmem:[#allocation1 + $0x8] sm:$0xff pattern:$0x75316420]  ;;  %p697_p5 = scmp.ne.s32.totalorder %s695_s23, %s696_s18  ;;  %p702_p10 = scmp.lt.s32.totalorder %s700_s30, %s696_s18 }
  0x29   : > { %vm302_vm1 = vcmp.eq.s32.totalorder %v874_v1, %v300_v4  ;;  %vm303_vm2 = vcmp.eq.s32.totalorder %v874_v1, %v301_v5  ;;  %v255_v14 = vsel %vm254_vm0, %v250_v12, -inf  ;;  %v262_v15 = vsel %vm254_vm0, %v251_v13, -inf }
  0x2a   : > { %v564_v7 = vsel %vm302_vm1, 1.0, %v764_v6  ;;  %v565_v8 = vsel %vm303_vm2, 1.0, %v764_v6  ;;  %v256_v16 = vrot.slane %v255_v14, 4  ;;  %v263_v17 = vrot.slane %v262_v15, 4  ;;  %p698_p6 = pnand %p697_p5, %p836_p9  ;;  %p703_p13 = por %p702_p10, %p701_p8 }
  0x2b   : > { %v407_v9 = vsel %vm254_vm0, %v564_v7, 0.0  ;;  %v408_v10 = vsel %vm254_vm0, %v565_v8, 0.0 }
  0x2c   : > { %v409_v11 = vadd.f32 %v408_v10, %v407_v9  ;;  %v257_v18 = vmax.f32 %v255_v14, %v256_v16  ;;  %v264_v19 = vmax.f32 %v262_v15, %v263_v17  ;;  %p699_p7 = pneg %p698_p6 }
  0x2e   : > { %410 = vadd.xlane.f32.xlu0 %v409_v11  ;;  %v258_v20 = vrot.slane %v257_v18, 2  ;;  %v265_v21 = vrot.slane %v264_v19, 2  ;;  %p704_p0 = pnand %p703_p13, %p699_p7 }
  0x30   : > { %v259_v22 = vmax.f32 %v257_v18, %v258_v20  ;;  %v266_v23 = vmax.f32 %v264_v19, %v265_v21 }
  0x32   : > { %v260_v24 = vrot.slane %v259_v22, 1  ;;  %v267_v25 = vrot.slane %v266_v23, 1 }
  0x34   : > { %v261_v26 = vmax.f32 %v259_v22, %v260_v24  ;;  %v268_v27 = vmax.f32 %v266_v23, %v267_v25 }
  0x36   : > { %v271_v28 = vrot.slane %v268_v27, 4 }
  0x38   : > { %v272_v29 = vsel %vm254_vm0, %v261_v26, %v271_v28 }
  0x39   : > { %v274_v30 = vsub.f32 %v247_v3, %v272_v29 }
  0x3b   : > { %v275_v31 = vmul.f32 1.442695, %v274_v30 }
  0x3d   : > { %640 = vpow2.f32 %v275_v31 }
  0x43   : > { %v641_v32 = vpop.eup %640 }
  0x44   : > { %278 = vst [vmem:[#allocation1] ss:$2 sm:$0xff] %v641_v32 }
  0x4b   : > { %v279_v33 = vld.sshfl [vmem:[#allocation1] sm:$0xff pattern:$0x75316420]  ;;  %v280_v34 = vld.sshfl [vmem:[#allocation1 + $0x8] sm:$0xff pattern:$0x75316420] }
  0x4c   : > { %308 = vst [vmem:[#allocation1] ss:$2 sm:$0xff] %v641_v32  ;;  %v283_v35 = vsel %vm254_vm0, %v279_v33, 0.0  ;;  %v290_v36 = vsel %vm254_vm0, %v280_v34, 0.0 }
  0x4d   : > { %v284_v37 = vrot.slane %v283_v35, 4  ;;  %v291_v38 = vrot.slane %v290_v36, 4 }
  0x4f   : > { %v285_v39 = vadd.f32 %v284_v37, %v283_v35  ;;  %v292_v40 = vadd.f32 %v291_v38, %v290_v36 }
  0x51   : > { %v286_v41 = vrot.slane %v285_v39, 2  ;;  %v293_v42 = vrot.slane %v292_v40, 2 }
  0x53   : > { %v309_v43 = vld.sshfl [vmem:[#allocation1] sm:$0xff pattern:$0x75316420]  ;;  %v310_v44 = vld.sshfl [vmem:[#allocation1 + $0x8] sm:$0xff pattern:$0x75316420]  ;;  %v287_v45 = vadd.f32 %v286_v41, %v285_v39  ;;  %v294_v46 = vadd.f32 %v293_v42, %v292_v40 }
  0x54   : > { %v313_v47 = vmul.f32 %v564_v7, %v309_v43  ;;  %v314_v48 = vmul.f32 %v565_v8, %v310_v44  ;;  %v413_v43 = vld [vmem:[%s935_s2] sm:$0xf] }
  0x55   : > { %v288_v49 = vrot.slane %v287_v45, 1  ;;  %v295_v50 = vrot.slane %v294_v46, 1 }
  0x56   : > { %v315_v51 = vsel %vm254_vm0, %v313_v47, 0.0  ;;  %v322_v52 = vsel %vm254_vm0, %v314_v48, 0.0 }
  0x57   : > { %v316_v53 = vrot.slane %v315_v51, 4  ;;  %v323_v54 = vrot.slane %v322_v52, 4  ;;  %v289_v55 = vadd.f32 %v288_v49, %v287_v45  ;;  %v296_v56 = vadd.f32 %v295_v50, %v294_v46 }
  0x59   : > { %v317_v57 = vadd.f32 %v316_v53, %v315_v51  ;;  %v324_v58 = vadd.f32 %v323_v54, %v322_v52  ;;  %642 = vrcp.f32 %v289_v55  ;;  %vm334_vm3 = vweird.f32 %v289_v55 }
  0x5a   : > { %644 = vrcp.f32 %v296_v56  ;;  %v338_v3 = vand.u32 2147483647, %v289_v55  ;;  %v340_v4 = vand.u32 2147483648, %v289_v55  ;;  %vm349_vm4 = vweird.f32 %v296_v56 }
  0x5b   : > { %v318_v59 = vrot.slane %v317_v57, 2  ;;  %v325_v60 = vrot.slane %v324_v58, 2  ;;  %v355_v8 = vand.u32 2147483648, %v296_v56  ;;  %v353_v11 = vand.u32 2147483647, %v296_v56 }
  0x5c   : > { %v341_v13 = vor.u32 1.1754944e-38, %v340_v4  ;;  %vm339_vm8 = vcmp.eq.f32.partialorder %v338_v3, 8.507059e+37 }
  0x5d   : > { %v319_v61 = vadd.f32 %v318_v59, %v317_v57  ;;  %v326_v63 = vadd.f32 %v325_v60, %v324_v58  ;;  %v356_v17 = vor.u32 1.1754944e-38, %v355_v8  ;;  %vm354_vm10 = vcmp.eq.f32.partialorder %v353_v11, 8.507059e+37 }
  0x5f   : > { %v643_v62 = vpop.eup %642  ;;  %v320_v6 = vrot.slane %v319_v61, 1  ;;  %v327_v9 = vrot.slane %v326_v63, 1 }
  0x60   : > { %v645_v0 = vpop.eup %644  ;;  %v330_v2 = vmul.f32 %v643_v62, %v289_v55  ;;  %vm335_vm5 = vweird.f32 %v643_v62 }
  0x61   : > { %v345_v5 = vmul.f32 %v645_v0, %v296_v56  ;;  %vm350_vm6 = vweird.f32 %v645_v0  ;;  %vm336_vm7 = vmor %vm334_vm3, %vm335_vm5  ;;  %v321_v15 = vadd.f32 %v320_v6, %v319_v61  ;;  %v328_v18 = vadd.f32 %v327_v9, %v326_v63 }
  0x62   : > { %v331_v7 = vsub.f32 1.0, %v330_v2  ;;  %vm351_vm9 = vmor %vm349_vm4, %vm350_vm6 }
  0x63   : > { %v346_v10 = vsub.f32 1.0, %v345_v5 }
  0x64   : > { %v332_v12 = vmul.f32 %v643_v62, %v331_v7 }
  0x65   : > { %v347_v14 = vmul.f32 %v645_v0, %v346_v10 }
  0x66   : > { %v333_v16 = vadd.f32 %v643_v62, %v332_v12 }
  0x67   : > { %v348_v19 = vadd.f32 %v645_v0, %v347_v14 }
  0x68   : > { %v337_v20 = vsel %vm336_vm7, %v643_v62, %v333_v16 }
  0x69   : > { %v342_v21 = vsel %vm339_vm8, %v341_v13, %v337_v20  ;;  %v352_v22 = vsel %vm351_vm9, %v645_v0, %v348_v19 }
  0x6a   : > { %v343_v23 = vmul.f32 %v342_v21, %v321_v15  ;;  %v357_v24 = vsel %vm354_vm10, %v356_v17, %v352_v22 }
  0x6b   : > { %v358_v25 = vmul.f32 %v357_v24, %v328_v18 }
  0x6c   : > { %v359_v26 = vadd.f32 1e-10, %v343_v23 }
  0x6d   : > { %v360_v27 = vadd.f32 1e-10, %v358_v25 }
  0x6e   : > { %646 = vlog2.f32 %v359_v26  ;;  %v365_v28 = vsub.f32 1.0, %v359_v26 }
  0x6f   : > { %648 = vlog2.f32 %v360_v27  ;;  %v366_v29 = vsub.f32 1.0, %v360_v27 }
  0x70   : > { %v367_v30 = vmul.f32 %v365_v28, %v365_v28 }
  0x71   : > { %v368_v31 = vmul.f32 %v366_v29, %v366_v29 }
  0x72   : > { %v369_v32 = vsub.f32 0.0, %v367_v30 }
  0x73   : > { %v370_v34 = vsub.f32 0.0, %v368_v31 }
  0x74   : > { %v647_v33 = vpop.eup %646 }
  0x75   : > { %v649_v35 = vpop.eup %648  ;;  %v362_v36 = vmul.f32 0.6931472, %v647_v33 }
  0x76   : > { %v364_v37 = vmul.f32 0.6931472, %v649_v35 }
  0x77   : > { %v371_v38 = vmul.f32 %v369_v32, %v362_v36 }
  0x78   : > { %v372_v39 = vmul.f32 %v370_v34, %v364_v37 }
  0x79   : > { %v386_v40 = vsel %vm385_vm11, %v371_v38, 0.0 }
  0x7a   : > { %v387_v41 = vsel %vm385_vm11, %v372_v39, 0.0 }
  0x7b   : > { %v388_v42 = vadd.f32 %v387_v41, %v386_v40 }
  0x7d   : > { %389 = vadd.xlane.f32.xlu0 %v388_v42 }
  0xa1   : > { %v411_v44 = vpop.xlane.xlu0 %410 }
  0xa2   : > { %v414_v45 = vmul.f32 %v413_v43, %v411_v44 }
  0xa4   : > { %v416_v46 = vsel %vm415_vm12, %v414_v45, 0.0 }
  0xa5   : > { %417 = vadd.xlane.f32.xlu1 %v416_v46 }
  0xf0   : > { %v390_v47 = vpop.xlane.xlu0 %389 }
  0xf1   : > { %v391_v48 = vrot.slane %v390_v47, 4 }
  0xf3   : > { %v392_v49 = vadd.f32 %v391_v48, %v390_v47 }
  0xf5   : > { %v393_v50 = vrot.slane %v392_v49, 2 }
  0xf7   : > { %v394_v51 = vadd.f32 %v393_v50, %v392_v49 }
  0xf9   : > { %v395_v52 = vrot.slane %v394_v51, 1 }
  0xfb   : > { %v396_v53 = vadd.f32 %v395_v52, %v394_v51 }
  0xfd   : > { %573 = vpush %v396_v53 }
 0x118   : > { %v418_v54 = vpop.xlane.xlu1 %417 }
 0x119   : > { %v419_v55 = vrot.slane %v418_v54, 4 }
 0x11b   : > { %v420_v56 = vadd.f32 %v419_v55, %v418_v54 }
 0x11d   : > { %v421_v57 = vrot.slane %v420_v56, 2 }
 0x11f   : > { %v422_v58 = vadd.f32 %v421_v57, %v420_v56 }
 0x121   : > { %v423_v59 = vrot.slane %v422_v58, 1 }
 0x123   : > { %v424_v60 = vadd.f32 %v423_v59, %v422_v58 }
 0x125   : > { %575 = vpush %v424_v60 }
 0x12e   : > { %s574_s19 = spop %573 }
 0x12f   : > { %v438_v62 = vstv %s574_s19 }
 0x156   : > { %s576_s22 = spop %575 }
 0x157   : > { %v436_v61 = vstv %s576_s22 }
 0x158   : > { %v437_v63 = vsel %vm434_vm13, %v436_v61, 0.0 }
 0x159   : > { %v439_v0 = vsel %vm432_vm14, %v438_v62, %v437_v63 }
 0x15a   : > { %440 = vst [vmem:[%s228_s9] sm:$0xff] %v439_v0 }
 0x15b   : > { %707 = shalt.err (!%p704_p0)
}
 0x15c   : > { %579 = dma.vmem_to_hbm [thread:$0]  (%p836_p9), %s455_s10, 128, %s457_s21, %s442_s15  }
 0x15d PF: > { %s468_s11 = sand.u32 1, %s742_s12   ;;  %p586_p1 = pnand %p556_p12, %p843_p11 }
 0x15e   : > { %s469_s5 = scalar_lea.sflag [#allocation5], %s468_s11 }
 0x15f   : > { %p587_p2 = pneg %p586_p1 }
 0x161   : > { %737 = dma.done.wait (%p587_p2), %s469_s5, 128  }
 0x162   : > { %739 = vsyncadd (%p587_p2), %s469_s5, 4294967168  ;;  %s19_s17 = sadd.s32 1, %s762_s17   ;;  %s941_s12 = smov %s746_s13 }
 0x163   : > { %p16_p3 = scmp.ge.s32.totalorder %s19_s17, 4   ;;  %s942_s13 = smov %s750_s14 }
 0x164   : > { %s943_s14 = smov %s841_s26  ;;  %s944_s15 = smov %s758_s16 }
 0x165   : > { %s945_s16 = smov %s947_s20  ;;  %18 = sbr.rel (!%p16_p3) target bundleno = 6 (0x6), region = 92 }
 0x16a   :  { %475 = vsyncpa [#allocation4], 1 }
 0x16b   :  { %477 = vsyncpa [#allocation4 + $0x1], 1 }
 0x16c   :  { %478 = vsyncpa [#allocation5], 1 }
 0x16d   :  { %480 = vsyncpa [#allocation5 + $0x1], 1 }

</bundles_post_ra>
